<compile_context>
chip_gen: v7x
topology: tpu7x:2x2x1
jax: 0.10.0
libtpu: 0.0.40
codegen_flags: <defaults>
</compile_context>

<pallas_src>
import functools

import jax
import jax.numpy as jnp
from jax.experimental import pallas as pl
from jax.experimental.pallas import tpu as pltpu


def _round_up(x, m):
    return ((x + m - 1) // m) * m


def _vmem_capacity_bytes():
    """Per-core VMEM capacity; conservative fallback (v7x) if the query fails."""
    try:
        info = pltpu.get_tpu_info()
        cap = getattr(info, "vmem_capacity_bytes", None)
        if cap:
            return int(cap)
    except Exception:
        pass
    return 64 * 1024 * 1024


# ---------------------------------------------------------------------------
# Kernels
# ---------------------------------------------------------------------------
def _fused_kernel(x_ref, wt_ref, o_ref, *, negative_slope):
    """Single K step: whole reduction in one MXU call, LeakyReLU fused."""
    y = jnp.dot(x_ref[...], wt_ref[...], preferred_element_type=jnp.float32)
    y = jnp.where(y >= 0, y, negative_slope * y)
    o_ref[...] = y.astype(o_ref.dtype)


def _tiled_kernel_f32out(x_ref, wt_ref, o_ref, *, negative_slope):
    """K-blocked fallback; accumulates directly into the resident f32 output."""
    k = pl.program_id(2)

    @pl.when(k == 0)
    def _():
        o_ref[...] = jnp.zeros_like(o_ref)

    o_ref[...] += jnp.dot(x_ref[...], wt_ref[...],
                          preferred_element_type=jnp.float32)

    @pl.when(k == pl.num_programs(2) - 1)
    def _():
        y = o_ref[...]
        o_ref[...] = jnp.where(y >= 0, y, negative_slope * y)


def _tiled_kernel_acc(x_ref, wt_ref, o_ref, acc_ref, *, negative_slope):
    """K-blocked fallback with f32 scratch accumulator (narrow output dtypes)."""
    k = pl.program_id(2)

    @pl.when(k == 0)
    def _():
        acc_ref[...] = jnp.zeros_like(acc_ref)

    acc_ref[...] += jnp.dot(x_ref[...], wt_ref[...],
                            preferred_element_type=jnp.float32)

    @pl.when(k == pl.num_programs(2) - 1)
    def _():
        y = acc_ref[...]
        o_ref[...] = jnp.where(y >= 0, y, negative_slope * y).astype(o_ref.dtype)


# ---------------------------------------------------------------------------
# Wrapper
# ---------------------------------------------------------------------------
def sentence_embedding_forward(x, weight, *, negative_slope=0.01,
                               compute_dtype=None,
                               tm_max=4096, tk_max=2048, tn_max=1024):
    """x: (batch, num_posts, h_in); weight: (h_out, h_in) as in nn.Linear (no bias).

    Set compute_dtype=jnp.bfloat16 to stream operands in bf16 (f32 accumulation);
    output dtype always matches the input dtype.
    """
    batch, num_posts, h_in = x.shape
    h_out, h_in_w = weight.shape
    assert h_in_w == h_in, "weight shape must be (h_out, h_in)"
    M = batch * num_posts
    out_dtype = x.dtype
    out_itemsize = jnp.dtype(out_dtype).itemsize

    if compute_dtype is not None:
        x = x.astype(compute_dtype)
        weight = weight.astype(compute_dtype)
    itemsize = jnp.dtype(x.dtype).itemsize
    # Sublane multiple for the second-minor block dim: 8 (f32), 16 (bf16), ...
    s = 8 * max(1, 4 // itemsize)

    # ---- K / N tiling: full-dim blocks (no padding) whenever they fit. -----
    if h_in <= tk_max:
        tk, K_p = h_in, h_in
    else:
        tk = 512                      # multiple of 256 (v6e/v7x MXU) and 128 lanes
        K_p = _round_up(h_in, tk)
    if h_out <= tn_max:
        tn, N_p = h_out, h_out
    else:
        tn = 512
        N_p = _round_up(h_out, tn)
    nk = K_p // tk
    nj = N_p // tn

    # ---- row tile: large to amortize the ~0.35us per-grid-step overhead. ---
    tm = _round_up(min(tm_max, _round_up(M, s)), s)
    # v7x has 2 TensorCores/chip: give the "parallel" row axis >= 2 steps for
    # large-M problems so both cores get work (no-op on v5e/v6e, and skipped
    # for tiny M where a single step is cheapest).
    if M > 1024 and pl.cdiv(M, tm) < 2:
        tm = _round_up(pl.cdiv(M, 2), s)

    # ---- VMEM budget: query the chip; leave headroom for Mosaic scratch. ---
    vmem_cap = _vmem_capacity_bytes()
    vmem_limit = min(vmem_cap * 3 // 4, 100 * 1024 * 1024)  # ~48 MiB v7x, ~96 MiB v5e/v6e
    budget = int(vmem_limit * 0.8)

    def _ws_bytes(tm_, tk_, tn_, nk_):
        ws = 2 * tm_ * tk_ * itemsize          # x tile (double-buffered)
        ws += 2 * tk_ * tn_ * itemsize         # W^T tile (double-buffered)
        ws += 2 * tm_ * tn_ * out_itemsize     # output tile (double-buffered)
        if nk_ > 1 and out_itemsize < 4:
            ws += tm_ * tn_ * 4                # f32 accumulator scratch
        return ws

    while _ws_bytes(tm, tk, tn, nk) > budget:
        if nk > 1 and tk > 256:
            tk //= 2                           # shrink K tile before the row tile
            nk = K_p // tk
        elif tm > s:
            tm = max(s, _round_up(tm // 2, s))
        else:
            break

    ni = pl.cdiv(M, tm)

    # ---- layout glue only when K/N are actually blocked (rare, large dims) --
    x2d = x.reshape(M, h_in)
    w_t = weight.T
    if K_p != h_in:
        x2d = jnp.pad(x2d, ((0, 0), (0, K_p - h_in)))
        w_t = jnp.pad(w_t, ((0, K_p - h_in), (0, 0)))
    if N_p != h_out:
        w_t = jnp.pad(w_t, ((0, 0), (0, N_p - h_out)))

    cost = pl.CostEstimate(
        flops=2 * M * h_in * h_out,
        transcendentals=0,
        bytes_accessed=int(itemsize * (M * K_p * nj + K_p * N_p * ni)
                           + out_itemsize * M * N_p),
    )

    if nk == 1:
        # Fused single-K-step path (the common skinny-K embedding case).
        kernel = functools.partial(_fused_kernel, negative_slope=negative_slope)
        grid = (ni, nj)
        in_specs = [
            pl.BlockSpec((tm, K_p), lambda i, j: (i, 0)),
            pl.BlockSpec((K_p, tn), lambda i, j: (0, j)),
        ]
        out_specs = pl.BlockSpec((tm, tn), lambda i, j: (i, j))
        scratch_shapes = []
        dims = ("parallel", "parallel")
    else:
        # General K-blocked path (only when h_in > tk_max). Note: if nj > 1 the
        # x(i,k) blocks are re-streamed once per j; with the small-weight
        # embedding shapes nj == 1 so this never triggers in practice.
        if out_dtype == jnp.float32:
            kernel = functools.partial(_tiled_kernel_f32out,
                                       negative_slope=negative_slope)
            scratch_shapes = []
        else:
            kernel = functools.partial(_tiled_kernel_acc,
                                       negative_slope=negative_slope)
            scratch_shapes = [pltpu.VMEM((tm, tn), jnp.float32)]
        grid = (ni, nj, nk)
        in_specs = [
            pl.BlockSpec((tm, tk), lambda i, j, k: (i, k)),
            pl.BlockSpec((tk, tn), lambda i, j, k: (k, j)),
        ]
        out_specs = pl.BlockSpec((tm, tn), lambda i, j, k: (i, j))
        dims = ("parallel", "parallel", "arbitrary")

    out2d = pl.pallas_call(
        kernel,
        out_shape=jax.ShapeDtypeStruct((M, N_p), out_dtype),
        grid_spec=pltpu.PrefetchScalarGridSpec(
            num_scalar_prefetch=0,
            grid=grid,
            in_specs=in_specs,
            out_specs=out_specs,
            scratch_shapes=scratch_shapes,
        ),
        compiler_params=pltpu.CompilerParams(
            dimension_semantics=dims,
            vmem_limit_bytes=vmem_limit,
        ),
        cost_estimate=cost,
    )(x2d, w_t)

    if N_p != h_out:
        out2d = out2d[:, :h_out]
    return out2d.reshape(batch, num_posts, h_out)


if __name__ == "__main__":
    # Small deterministic setup consistent with the module's forward:
    # num_posts sentences per batch, each with an h_in-dim representation.
    batch, num_posts, h_in, h_out = 2, 8, 32, 32

    key = jax.random.PRNGKey(0)
    kx, kw = jax.random.split(key)
    x = jax.random.normal(kx, (batch, num_posts, h_in), dtype=jnp.float32)
    # Deterministic "nn.Linear" weight, shape (h_out, h_in), no bias.
    weight = jax.random.normal(kw, (h_out, h_in), dtype=jnp.float32) * (1.0 / h_in ** 0.5)

    # Exact-semantics (f32) path.
    out = sentence_embedding_forward(x, weight)
    out = jax.block_until_ready(out)

    # Reference in plain JAX (same math as the PyTorch module).
    ref = x @ weight.T
    ref = jnp.where(ref >= 0, ref, 0.01 * ref)
    assert out.shape == (batch, num_posts, h_out)
    assert jnp.allclose(out, ref, atol=1e-5, rtol=1e-5)

    # bf16-streamed fast path (halves HBM traffic); loose sanity tolerance.
    out_bf16 = jax.block_until_ready(
        sentence_embedding_forward(x, weight, compute_dtype=jnp.bfloat16))
    assert out_bf16.dtype == x.dtype
    assert jnp.allclose(out_bf16, ref, atol=1e-1, rtol=1e-1)

    print("KERNEL_OK")
</pallas_src>

<mosaic_0001>
module attributes {stable_mosaic.version = 11 : i64} {
  func.func @_fused_kernel(%arg0: i32, %arg1: i32, %arg2: memref<16x32xf32, #tpu.memory_space<vmem>>, %arg3: memref<32x32xf32, #tpu.memory_space<vmem>>, %arg4: memref<16x32xf32, #tpu.memory_space<vmem>>) attributes {dimension_semantics = [#tpu.dimension_semantics<parallel>, #tpu.dimension_semantics<parallel>], iteration_bounds = array<i64: 1, 1>, scalar_prefetch = 0 : i64, scratch_operands = 0 : i64, tpu.core_type = #tpu.core_type<tc>, window_params = [{transform_indices = @transform_0, window_bounds = array<i64: 16, 32>}, {transform_indices = @transform_1, window_bounds = array<i64: 32, 32>}, {transform_indices = @transform_2, window_bounds = array<i64: 16, 32>}]} {
    %c0 = arith.constant 0 : index
    %c0_0 = arith.constant 0 : index
    %0 = vector.load %arg2[%c0, %c0_0] : memref<16x32xf32, #tpu.memory_space<vmem>>, vector<16x32xf32>
    %c0_1 = arith.constant 0 : index
    %c0_2 = arith.constant 0 : index
    %1 = vector.load %arg3[%c0_1, %c0_2] : memref<32x32xf32, #tpu.memory_space<vmem>>, vector<32x32xf32>
    %cst = arith.constant dense<0.000000e+00> : vector<16x32xf32>
    %2 = tpu.matmul %0, %1, %cst {dimension_numbers = #tpu.dot_dimension_numbers<[1], [0], [0], [1], [0, 0, 1, 1], [], []>} : vector<16x32xf32>, vector<32x32xf32>, vector<16x32xf32> -> vector<16x32xf32>
    %cst_3 = arith.constant 0.000000e+00 : f32
    %3 = vector.broadcast %cst_3 : f32 to vector<16x32xf32>
    %4 = arith.cmpf oge, %2, %3 : vector<16x32xf32>
    %cst_4 = arith.constant 0.00999999977 : f32
    %5 = vector.broadcast %cst_4 : f32 to vector<16x32xf32>
    %6 = arith.mulf %5, %2 : vector<16x32xf32>
    %7 = arith.select %4, %2, %6 : vector<16x32xi1>, vector<16x32xf32>
    %c0_5 = arith.constant 0 : index
    %c0_6 = arith.constant 0 : index
    %8 = vector.load %arg4[%c0_5, %c0_6] : memref<16x32xf32, #tpu.memory_space<vmem>>, vector<16x32xf32>
    tpu.vector_store %arg4[%c0_5, %c0_6], %7 {strides = array<i32>} : memref<16x32xf32, #tpu.memory_space<vmem>>, vector<16x32xf32>,
    return
  }
  func.func @transform_0(%arg0: i32, %arg1: i32) -> (i32, i32) {
    %c0_i32 = arith.constant 0 : i32
    %c0_i32_0 = arith.constant 0 : i32
    return %arg0, %c0_i32 : i32, i32
  }
  func.func @transform_1(%arg0: i32, %arg1: i32) -> (i32, i32) {
    %c0_i32 = arith.constant 0 : i32
    %c0_i32_0 = arith.constant 0 : i32
    return %c0_i32, %arg1 : i32, i32
  }
  func.func @transform_2(%arg0: i32, %arg1: i32) -> (i32, i32) {
    %c0_i32 = arith.constant 0 : i32
    return %arg0, %arg1 : i32, i32
  }
}

</mosaic_0001>

<bundles_post_ra>
// kernel: tpu_custom_call.1
= control target key start
LH: loop header
LB: loop body
LE: loop exit
PB: predicated region body
PF: predicated region fallthrough
CT: control target
= control target key end

     0   :  { %7 = vsyncpa [#allocation3], 0  ;;  %s327_s0 = inlined_call_operand.hbm [shape: f32[16,32], index: 0, kind: input, shape index: {}]   ;;  %s328_s1 = inlined_call_operand.hbm [shape: f32[32,32], index: 1, kind: input, shape index: {}]   ;;  %s329_s2 = inlined_call_operand.hbm [shape: f32[16,32], index: 2, kind: output, shape index: {}]  }
   0x1   :  { %8 = vsyncpa [#allocation6], 0 }
   0x2   :  { %9 = vsyncpa [#allocation4], 0  ;;  %s258_s9 = smov [#allocation2]   ;;  %s186_s13 = scalar_lea.hbm %s327_s0, 256 }
   0x3   :  { %s15_s10 = sshll.u32 %s258_s9, 4  ;;  %p187_p0 = scmp.ne.s32.totalorder %s327_s0, %s186_s13  ;;  %s16_s10 = int_to_ptr.vmem [resolvable:$true] %s15_s10 }
   0x4   :  { %p190_p1 = scmp.lt.u32.totalorder %s186_s13, %s327_s0 }
   0x6   :  { %p192_p2 = pnand %p190_p1, %p187_p0 }
   0x8   :  { %195 = shalt.err (!%p192_p2)
}
   0x9   :  { %s196_s18 = scalar_lea.vmem %s16_s10, 256  ;;  %p201_p4 = scmp.lt.s32.totalorder %s16_s10, %s16_s10 }
   0xa   :  { %p197_p3 = scmp.ne.s32.totalorder %s16_s10, %s196_s18  ;;  %p202_p5 = scmp.lt.s32.totalorder %s196_s18, %s196_s18 }
   0xc   :  { %p203_p6 = por %p202_p5, %p201_p4 }
   0xe   :  { %p204_p7 = pnand %p203_p6, %p197_p3 }
  0x10   :  { %207 = shalt.err (!%p204_p7)
}
  0x11   :  { %s259_s19 = smov 128   ;;  %s260_s20 = smov 8  }
  0x12   :  { %21 = dma.hbm_to_vmem [thread:$0]  %s327_s0, 256, %s16_s10, [#allocation3], %s259_s19, %s259_s19, %s260_s20  }
  0x13   :  { %s261_s23 = smov [#allocation5]   ;;  %s208_s27 = scalar_lea.hbm %s328_s1, 512 }
  0x14   :  { %s27_s24 = sshll.u32 %s261_s23, 4  ;;  %p209_p8 = scmp.ne.s32.totalorder %s328_s1, %s208_s27  ;;  %s28_s24 = int_to_ptr.vmem [resolvable:$true] %s27_s24 }
  0x15   :  { %p212_p9 = scmp.lt.u32.totalorder %s208_s27, %s328_s1 }
  0x17   :  { %p214_p10 = pnand %p212_p9, %p209_p8 }
  0x19   :  { %217 = shalt.err (!%p214_p10)
}
  0x1a   :  { %s218_s4 = scalar_lea.vmem %s28_s24, 512  ;;  %p223_p12 = scmp.lt.s32.totalorder %s28_s24, %s28_s24 }
  0x1b   :  { %p219_p11 = scmp.ne.s32.totalorder %s28_s24, %s218_s4  ;;  %p224_p13 = scmp.lt.s32.totalorder %s218_s4, %s218_s4 }
  0x1d   :  { %p225_p0 = por %p224_p13, %p223_p12 }
  0x1f   :  { %p226_p1 = pnand %p225_p0, %p219_p11 }
  0x21   :  { %229 = shalt.err (!%p226_p1)
}
  0x22   :  { %33 = dma.hbm_to_vmem [thread:$0]  %s328_s1, 512, %s28_s24, [#allocation6], %s259_s19, %s259_s19, %s260_s20  }
  0x23   :  { %252 = dma.done.wait [#allocation3], 256  }
  0x24   :  { %253 = vsyncadd [#allocation3], 4294967040 }
  0x25   :  { %254 = dma.done.wait [#allocation6], 512  }
  0x26   :  { %255 = vsyncadd [#allocation6], 4294966784  ;;  %vm46_vm0 = vcmask 261120   ;;  %v42_v0 = vld [vmem:[#allocation5] sm:$0xff]  ;;  %v43_v1 = vld [vmem:[#allocation5 + $0x8] sm:$0xff]  ;;  %s262_s1 = smov [#allocation7]  }
  0x27   :  { %v44_v2 = vld [vmem:[#allocation5 + $0x10] sm:$0xff]  ;;  %v173_v3 = vpack.c.bf16 %v43_v1, %v42_v0  ;;  %v45_v4 = vld [vmem:[#allocation5 + $0x18] sm:$0xff]  ;;  %s141_s6 = sshll.u32 %s262_s1, 4  ;;  %s142_s6 = int_to_ptr.vmem [resolvable:$true] %s141_s6 }
  0x28   :  { %v40_v5 = vld [vmem:[#allocation2] sm:$0xff]  ;;  %v177_v6 = vpack.c.bf16 %v45_v4, %v44_v2  ;;  %v41_v7 = vld [vmem:[#allocation2 + $0x8] sm:$0xff]  ;;  %s230_s7 = scalar_lea.vmem %s142_s6, 256  ;;  %p235_p3 = scmp.lt.s32.totalorder %s142_s6, %s142_s6 }
  0x29   :  { %170 = vmatprep.mubr.msk.f32.mxu0 %vm46_vm0, %v40_v5  ;;  %174 = vmatprep.subr.bf16.mxu0 %v173_v3  ;;  %p231_p2 = scmp.ne.s32.totalorder %s142_s6, %s230_s7  ;;  %p236_p4 = scmp.lt.s32.totalorder %s230_s7, %s230_s7 }
  0x2a   :  { %176 = vmatpush3.bf16.msra.mxu0 %v173_v3 }
  0x2b   :  { %178 = vmatprep.subr.bf16.mxu0 %v177_v6  ;;  %p237_p5 = por %p236_p4, %p235_p3 }
  0x2d   :  { %p238_p6 = pnand %p237_p5, %p231_p2 }
  0x2e   :  { %180 = vmatpush3.bf16.msra.mxu0 %v177_v6 }
  0x31   :  { %171 = vmatmul.mubr.msk.f32.vlgmr.msra.gmra.mrb[0].mxu0 %vm46_vm0, %v41_v7 }
 0x104   :  { %v172_v8 = vpop.f32.mrb[0].mxu0 }
 0x105   :  { %vm129_vm1 = vcmp.ge.f32.partialorder %v172_v8, 0.0  ;;  %v131_v9 = vmul.f32 0.01, %v172_v8  ;;  %v119_v10 = vpop.f32.mrb[1].mxu0 }
 0x106   :  { %vm128_vm2 = vcmp.ge.f32.partialorder %v119_v10, 0.0  ;;  %v130_v11 = vmul.f32 0.01, %v119_v10 }
 0x107   :  { %v133_v12 = vsel %vm129_vm1, %v172_v8, %v131_v9 }
 0x108   :  { %135 = vst.msk [vmem:[#allocation7 + $0x8] sm:$0xff] %vm46_vm0, %v133_v12  ;;  %v132_v13 = vsel %vm128_vm2, %v119_v10, %v130_v11 }
 0x109   :  { %134 = vst.msk [vmem:[#allocation7] sm:$0xff] %vm46_vm0, %v132_v13 }
 0x10a   :  { %241 = shalt.err (!%p238_p6)
}
 0x10b   :  { %s242_s10 = scalar_lea.hbm %s329_s2, 256 }
 0x10c   :  { %p243_p7 = scmp.ne.s32.totalorder %s329_s2, %s242_s10  ;;  %p246_p8 = scmp.lt.u32.totalorder %s242_s10, %s329_s2 }
 0x10e   :  { %p248_p9 = pnand %p246_p8, %p243_p7 }
 0x110   :  { %251 = shalt.err (!%p248_p9)
}
 0x111   :  { %147 = dma.vmem_to_hbm [thread:$0]  %s142_s6, 256, %s329_s2, [#allocation4], %s259_s19, %s259_s19, %s260_s20  }
 0x112   :  { %256 = dma.done.wait [#allocation4], 256  }
 0x113   :  { %257 = vsyncadd [#allocation4], 4294967040 }
 0x114   :  { %151 = vsyncpa [#allocation3], 1 }
 0x115   :  { %152 = vsyncpa [#allocation6], 1 }
 0x116   :  { %153 = vsyncpa [#allocation4], 1 }

</bundles_post_ra>
